<compile_context>
chip_gen: v7x
topology: tpu7x:2x2x1
jax: 0.10.0
libtpu: 0.0.40
codegen_flags: <defaults>
</compile_context>

<pallas_src>
import functools

import jax
import jax.numpy as jnp
from jax import lax
from jax.experimental import pallas as pl
from jax.experimental.pallas import tpu as pltpu

_LANE = 128


# ----------------------------------------------------------------------------
# Glue: MaxPool2d(kernel=(pw,ph), stride=(pw,ph), padding=0, ceil_mode=True)
# ----------------------------------------------------------------------------
def _maxpool2d_ceil(x, patch_w, patch_h):
    """NCHW max pool with stride == kernel and ceil_mode=True (pad with -inf)."""
    n, c, h, w = x.shape
    h_out = -(-h // patch_w)  # ceil
    w_out = -(-w // patch_h)
    pad_h = h_out * patch_w - h
    pad_w = w_out * patch_h - w
    x = jnp.pad(
        x,
        ((0, 0), (0, 0), (0, pad_h), (0, pad_w)),
        constant_values=-jnp.inf,
    )
    return lax.reduce_window(
        x,
        -jnp.inf,
        lax.max,
        window_dimensions=(1, 1, patch_w, patch_h),
        window_strides=(1, 1, patch_w, patch_h),
        padding="VALID",
    )


# ----------------------------------------------------------------------------
# Pallas kernel: per-batch normalized Gram matrices + squared-error reduction
# ----------------------------------------------------------------------------
def _pairwise_loss_kernel(fs_ref, ft_ref, o_ref, *, nb):
    # fs_ref / ft_ref block: (nb, C, Mp) bf16 ; o_ref block: (1, 8, 128) f32.
    def normed_bf16(f):
        # L2 norm over channels per position (+1e-8, matches L2()); norm math
        # stays in f32 (v5e has no bf16 VPU/EUP); reciprocal goes to the EUP.
        inv = pl.reciprocal(
            jnp.sqrt(jnp.sum(f * f, axis=0, keepdims=True)) + 1e-8,
            approx=True,
        )
        return (f * inv).astype(jnp.bfloat16)

    partial = jnp.float32(0.0)
    for b in range(nb):  # nb is a small static constant -> fully unrolled
        fs = fs_ref[b].astype(jnp.float32)  # (C, Mp)
        ft = ft_ref[b].astype(jnp.float32)  # (C, Mp)
        fns = normed_bf16(fs)
        fnt = normed_bf16(ft)
        # Gram over positions: contract the channel axis -> (Mp, Mp), f32 acc.
        g_s = lax.dot_general(
            fns, fns, (((0,), (0,)), ((), ())),
            preferred_element_type=jnp.float32)
        g_t = lax.dot_general(
            fnt, fnt, (((0,), (0,)), ((), ())),
            preferred_element_type=jnp.float32)
        d = g_t - g_s
        # Raw squared-error sum; the 1/(M^2 * N) scale is applied once in the
        # wrapper (hoisted off the M^2 element-wise path).
        partial = partial + jnp.sum(d * d)

    # Lane-dense (8,128) output tile; wrapper reads element [*, 0, 0].
    o_ref[...] = jnp.full((1, 8, 128), partial, dtype=jnp.float32)


# ----------------------------------------------------------------------------
# Module equivalent
# ----------------------------------------------------------------------------
def criterion_pairwise_for_whole_feat_after_pool(feat_s, feat_t, scale):
    """Forward pass of CriterionPairWiseForWholeFeatAfterPool (NCHW inputs)."""
    # NOTE: total_w/total_h deliberately mirror the PyTorch quirk
    # (shape[2] is H but named total_w) so pooling matches the original module.
    total_w, total_h = feat_t.shape[2], feat_t.shape[3]
    patch_w, patch_h = int(total_w * scale), int(total_h * scale)

    pooled_s = _maxpool2d_ceil(feat_s, patch_w, patch_h)
    pooled_t = _maxpool2d_ceil(feat_t, patch_w, patch_h)

    n, c, hp, wp = pooled_t.shape
    m = hp * wp

    # bf16 kernel inputs: halves HBM->VMEM DMA bytes and input double buffers.
    fs = pooled_s.astype(jnp.bfloat16).reshape(n, c, m)
    ft = pooled_t.astype(jnp.bfloat16).reshape(n, c, m)

    # Lane-pad positions to a multiple of 128: zero positions have zero
    # normalized features -> contribute exactly 0 to the Gram / loss.
    mp = -(-m // _LANE) * _LANE

    # Batch elements per grid step (amortizes ~0.35us/step overhead), capped
    # so the bf16 input double buffers (2 inputs x 2 buffers) stay <= ~8 MiB.
    per_elem_bytes = c * mp * 2
    nb = max(1, min(n, 8, (8 << 20) // max(1, 4 * per_elem_bytes)))
    n_pad = -(-n // nb) * nb  # zero-padded batch elements also contribute 0

    fs = jnp.pad(fs, ((0, n_pad - n), (0, 0), (0, mp - m)))
    ft = jnp.pad(ft, ((0, n_pad - n), (0, 0), (0, mp - m)))
    n_blocks = n_pad // nb

    partials = pl.pallas_call(
        functools.partial(_pairwise_loss_kernel, nb=nb),
        out_shape=jax.ShapeDtypeStruct((n_blocks, 8, 128), jnp.float32),
        grid_spec=pltpu.PrefetchScalarGridSpec(
            num_scalar_prefetch=0,
            grid=(n_blocks,),
            in_specs=[
                pl.BlockSpec((nb, c, mp), lambda b: (b, 0, 0)),
                pl.BlockSpec((nb, c, mp), lambda b: (b, 0, 0)),
            ],
            out_specs=pl.BlockSpec((1, 8, 128), lambda b: (b, 0, 0)),
        ),
        compiler_params=pltpu.CompilerParams(
            dimension_semantics=("parallel",),   # independent output blocks
            vmem_limit_bytes=32 * 1024 * 1024,
        ),
    )(fs, ft)

    # Hoisted scale: / (H'*W')^2 / N applied once to the scalar sum.
    inv_scale = 1.0 / (float(m) * float(m) * float(n))
    return jnp.sum(partials[:, 0, 0]) * jnp.float32(inv_scale)


# ----------------------------------------------------------------------------
# Pure-JAX reference (mirrors the PyTorch math) for a sanity check
# ----------------------------------------------------------------------------
def _ref_similarity(feat):
    feat = feat.astype(jnp.float32)
    tmp = jnp.sqrt(jnp.sum(feat ** 2, axis=1, keepdims=True)) + 1e-8
    feat = feat / tmp
    feat = feat.reshape(feat.shape[0], feat.shape[1], -1)
    return jnp.einsum("icm,icn->imn", feat, feat)


def _ref_loss(feat_s, feat_t, scale):
    total_w, total_h = feat_t.shape[2], feat_t.shape[3]
    patch_w, patch_h = int(total_w * scale), int(total_h * scale)
    ps = _maxpool2d_ceil(feat_s, patch_w, patch_h)
    pt = _maxpool2d_ceil(feat_t, patch_w, patch_h)
    sim_err = (_ref_similarity(pt) - _ref_similarity(ps)) ** 2
    sim_err = sim_err / (pt.shape[-1] * pt.shape[-2]) ** 2 / pt.shape[0]
    return jnp.sum(sim_err)


if __name__ == "__main__":
    key = jax.random.PRNGKey(0)
    k1, k2 = jax.random.split(key)

    # Small NCHW shapes: batch=2, channels=4, spatial=16x16, scale=0.25
    # -> maxpool kernel 4x4 -> pooled 4x4 -> M = 16 spatial positions.
    n, c, h, w = 2, 4, 16, 16
    scale = 0.25
    feat_s = jax.random.normal(k1, (n, c, h, w), dtype=jnp.float32)
    feat_t = jax.random.normal(k2, (n, c, h, w), dtype=jnp.float32)

    loss = criterion_pairwise_for_whole_feat_after_pool(feat_s, feat_t, scale)
    loss = jax.block_until_ready(loss)

    ref = jax.block_until_ready(_ref_loss(feat_s, feat_t, scale))
    assert jnp.isfinite(loss), "non-finite loss"
    # bf16 MXU operands + bf16 inputs + approx EUP reciprocal: loosened
    # tolerance vs. the f32 reference (fine for a distillation loss).
    assert jnp.allclose(loss, ref, rtol=5e-2, atol=1e-4), (loss, ref)

    print("KERNEL_OK")
</pallas_src>

<mosaic_0001>
module attributes {stable_mosaic.version = 11 : i64} {
  func.func @_pairwise_loss_kernel(%arg0: i32, %arg1: memref<2x4x128xbf16, #tpu.memory_space<vmem>>, %arg2: memref<2x4x128xbf16, #tpu.memory_space<vmem>>, %arg3: memref<1x8x128xf32, #tpu.memory_space<vmem>>) attributes {dimension_semantics = [#tpu.dimension_semantics<parallel>], iteration_bounds = array<i64: 1>, scalar_prefetch = 0 : i64, scratch_operands = 0 : i64, tpu.core_type = #tpu.core_type<tc>, window_params = [{transform_indices = @transform_0, window_bounds = array<i64: 2, 4, 128>}, {transform_indices = @transform_1, window_bounds = array<i64: 2, 4, 128>}, {transform_indices = @transform_2, window_bounds = array<i64: 1, 8, 128>}]} {
    %c0 = arith.constant 0 : index
    %c0_0 = arith.constant 0 : index
    %c0_1 = arith.constant 0 : index
    %0 = vector.load %arg1[%c0, %c0_0, %c0_1] : memref<2x4x128xbf16, #tpu.memory_space<vmem>>, vector<1x4x128xbf16>
    %1 = vector.shape_cast %0 : vector<1x4x128xbf16> to vector<4x128xbf16>
    %2 = arith.extf %1 : vector<4x128xbf16> to vector<4x128xf32>
    %c0_2 = arith.constant 0 : index
    %c0_3 = arith.constant 0 : index
    %c0_4 = arith.constant 0 : index
    %3 = vector.load %arg2[%c0_2, %c0_3, %c0_4] : memref<2x4x128xbf16, #tpu.memory_space<vmem>>, vector<1x4x128xbf16>
    %4 = vector.shape_cast %3 : vector<1x4x128xbf16> to vector<4x128xbf16>
    %5 = arith.extf %4 : vector<4x128xbf16> to vector<4x128xf32>
    %6 = arith.mulf %2, %2 : vector<4x128xf32>
    %cst = arith.constant dense<0.000000e+00> : vector<128xf32>
    %7 = vector.multi_reduction <add>, %6, %cst [0] : vector<4x128xf32> to vector<128xf32>
    %8 = vector.shape_cast %7 : vector<128xf32> to vector<1x128xf32>
    %9 = math.sqrt %8 : vector<1x128xf32>
    %cst_5 = arith.constant 9.99999993E-9 : f32
    %10 = vector.broadcast %cst_5 : f32 to vector<1x128xf32>
    %11 = arith.addf %9, %10 : vector<1x128xf32>
    %12 = tpu.reciprocal %11 {approx = true} : vector<1x128xf32> -> vector<1x128xf32>
    %13 = vector.broadcast %12 : vector<1x128xf32> to vector<4x128xf32>
    %14 = arith.mulf %2, %13 : vector<4x128xf32>
    %15 = arith.truncf %14 : vector<4x128xf32> to vector<4x128xbf16>
    %16 = arith.mulf %5, %5 : vector<4x128xf32>
    %cst_6 = arith.constant dense<0.000000e+00> : vector<128xf32>
    %17 = vector.multi_reduction <add>, %16, %cst_6 [0] : vector<4x128xf32> to vector<128xf32>
    %18 = vector.shape_cast %17 : vector<128xf32> to vector<1x128xf32>
    %19 = math.sqrt %18 : vector<1x128xf32>
    %cst_7 = arith.constant 9.99999993E-9 : f32
    %20 = vector.broadcast %cst_7 : f32 to vector<1x128xf32>
    %21 = arith.addf %19, %20 : vector<1x128xf32>
    %22 = tpu.reciprocal %21 {approx = true} : vector<1x128xf32> -> vector<1x128xf32>
    %23 = vector.broadcast %22 : vector<1x128xf32> to vector<4x128xf32>
    %24 = arith.mulf %5, %23 : vector<4x128xf32>
    %25 = arith.truncf %24 : vector<4x128xf32> to vector<4x128xbf16>
    %cst_8 = arith.constant dense<0.000000e+00> : vector<128x128xf32>
    %26 = tpu.matmul %15, %15, %cst_8 {dimension_numbers = #tpu.dot_dimension_numbers<[0], [0], [1], [1], [0, 1, 1, 1], [], []>} : vector<4x128xbf16>, vector<4x128xbf16>, vector<128x128xf32> -> vector<128x128xf32>
    %cst_9 = arith.constant dense<0.000000e+00> : vector<128x128xf32>
    %27 = tpu.matmul %25, %25, %cst_9 {dimension_numbers = #tpu.dot_dimension_numbers<[0], [0], [1], [1], [0, 1, 1, 1], [], []>} : vector<4x128xbf16>, vector<4x128xbf16>, vector<128x128xf32> -> vector<128x128xf32>
    %28 = arith.subf %27, %26 : vector<128x128xf32>
    %29 = arith.mulf %28, %28 : vector<128x128xf32>
    %30 = vector.shape_cast %29 : vector<128x128xf32> to vector<1x128x128xf32>
    %cst_10 = arith.constant dense<0.000000e+00> : vector<1xf32>
    %31 = vector.multi_reduction <add>, %30, %cst_10 [1, 2] : vector<1x128x128xf32> to vector<1xf32>
    %32 = vector.shape_cast %31 : vector<1xf32> to vector<1x1x1xf32>
    %33 = vector.extract %32[0, 0, 0] : f32 from vector<1x1x1xf32>
    %cst_11 = arith.constant 0.000000e+00 : f32
    %34 = arith.addf %cst_11, %33 : f32
    %c1 = arith.constant 1 : index
    %c0_12 = arith.constant 0 : index
    %c0_13 = arith.constant 0 : index
    %35 = vector.load %arg1[%c1, %c0_12, %c0_13] : memref<2x4x128xbf16, #tpu.memory_space<vmem>>, vector<1x4x128xbf16>
    %36 = vector.shape_cast %35 : vector<1x4x128xbf16> to vector<4x128xbf16>
    %37 = arith.extf %36 : vector<4x128xbf16> to vector<4x128xf32>
    %c1_14 = arith.constant 1 : index
    %c0_15 = arith.constant 0 : index
    %c0_16 = arith.constant 0 : index
    %38 = vector.load %arg2[%c1_14, %c0_15, %c0_16] : memref<2x4x128xbf16, #tpu.memory_space<vmem>>, vector<1x4x128xbf16>
    %39 = vector.shape_cast %38 : vector<1x4x128xbf16> to vector<4x128xbf16>
    %40 = arith.extf %39 : vector<4x128xbf16> to vector<4x128xf32>
    %41 = arith.mulf %37, %37 : vector<4x128xf32>
    %cst_17 = arith.constant dense<0.000000e+00> : vector<128xf32>
    %42 = vector.multi_reduction <add>, %41, %cst_17 [0] : vector<4x128xf32> to vector<128xf32>
    %43 = vector.shape_cast %42 : vector<128xf32> to vector<1x128xf32>
    %44 = math.sqrt %43 : vector<1x128xf32>
    %cst_18 = arith.constant 9.99999993E-9 : f32
    %45 = vector.broadcast %cst_18 : f32 to vector<1x128xf32>
    %46 = arith.addf %44, %45 : vector<1x128xf32>
    %47 = tpu.reciprocal %46 {approx = true} : vector<1x128xf32> -> vector<1x128xf32>
    %48 = vector.broadcast %47 : vector<1x128xf32> to vector<4x128xf32>
    %49 = arith.mulf %37, %48 : vector<4x128xf32>
    %50 = arith.truncf %49 : vector<4x128xf32> to vector<4x128xbf16>
    %51 = arith.mulf %40, %40 : vector<4x128xf32>
    %cst_19 = arith.constant dense<0.000000e+00> : vector<128xf32>
    %52 = vector.multi_reduction <add>, %51, %cst_19 [0] : vector<4x128xf32> to vector<128xf32>
    %53 = vector.shape_cast %52 : vector<128xf32> to vector<1x128xf32>
    %54 = math.sqrt %53 : vector<1x128xf32>
    %cst_20 = arith.constant 9.99999993E-9 : f32
    %55 = vector.broadcast %cst_20 : f32 to vector<1x128xf32>
    %56 = arith.addf %54, %55 : vector<1x128xf32>
    %57 = tpu.reciprocal %56 {approx = true} : vector<1x128xf32> -> vector<1x128xf32>
    %58 = vector.broadcast %57 : vector<1x128xf32> to vector<4x128xf32>
    %59 = arith.mulf %40, %58 : vector<4x128xf32>
    %60 = arith.truncf %59 : vector<4x128xf32> to vector<4x128xbf16>
    %cst_21 = arith.constant dense<0.000000e+00> : vector<128x128xf32>
    %61 = tpu.matmul %50, %50, %cst_21 {dimension_numbers = #tpu.dot_dimension_numbers<[0], [0], [1], [1], [0, 1, 1, 1], [], []>} : vector<4x128xbf16>, vector<4x128xbf16>, vector<128x128xf32> -> vector<128x128xf32>
    %cst_22 = arith.constant dense<0.000000e+00> : vector<128x128xf32>
    %62 = tpu.matmul %60, %60, %cst_22 {dimension_numbers = #tpu.dot_dimension_numbers<[0], [0], [1], [1], [0, 1, 1, 1], [], []>} : vector<4x128xbf16>, vector<4x128xbf16>, vector<128x128xf32> -> vector<128x128xf32>
    %63 = arith.subf %62, %61 : vector<128x128xf32>
    %64 = arith.mulf %63, %63 : vector<128x128xf32>
    %65 = vector.shape_cast %64 : vector<128x128xf32> to vector<1x128x128xf32>
    %cst_23 = arith.constant dense<0.000000e+00> : vector<1xf32>
    %66 = vector.multi_reduction <add>, %65, %cst_23 [1, 2] : vector<1x128x128xf32> to vector<1xf32>
    %67 = vector.shape_cast %66 : vector<1xf32> to vector<1x1x1xf32>
    %68 = vector.extract %67[0, 0, 0] : f32 from vector<1x1x1xf32>
    %69 = arith.addf %34, %68 : f32
    %70 = vector.broadcast %69 : f32 to vector<1x8x128xf32>
    %c0_24 = arith.constant 0 : index
    %c0_25 = arith.constant 0 : index
    %c0_26 = arith.constant 0 : index
    %71 = vector.load %arg3[%c0_24, %c0_25, %c0_26] : memref<1x8x128xf32, #tpu.memory_space<vmem>>, vector<1x8x128xf32>
    tpu.vector_store %arg3[%c0_24, %c0_25, %c0_26], %70 {strides = array<i32>} : memref<1x8x128xf32, #tpu.memory_space<vmem>>, vector<1x8x128xf32>,
    return
  }
  func.func @transform_0(%arg0: i32) -> (i32, i32, i32) {
    %c0_i32 = arith.constant 0 : i32
    %c0_i32_0 = arith.constant 0 : i32
    %c0_i32_1 = arith.constant 0 : i32
    return %arg0, %c0_i32, %c0_i32_0 : i32, i32, i32
  }
  func.func @transform_1(%arg0: i32) -> (i32, i32, i32) {
    %c0_i32 = arith.constant 0 : i32
    %c0_i32_0 = arith.constant 0 : i32
    %c0_i32_1 = arith.constant 0 : i32
    return %arg0, %c0_i32, %c0_i32_0 : i32, i32, i32
  }
  func.func @transform_2(%arg0: i32) -> (i32, i32, i32) {
    %c0_i32 = arith.constant 0 : i32
    %c0_i32_0 = arith.constant 0 : i32
    %c0_i32_1 = arith.constant 0 : i32
    return %arg0, %c0_i32, %c0_i32_0 : i32, i32, i32
  }
}

</mosaic_0001>

<bundles_post_ra>
// kernel: tpu_custom_call.1
= control target key start
LH: loop header
LB: loop body
LE: loop exit
PB: predicated region body
PF: predicated region fallthrough
CT: control target
= control target key end

     0   :  { %7 = vsyncpa [#allocation3], 0  ;;  %s1239_s0 = inlined_call_operand.hbm [shape: bf16[2,4,128], index: 0, kind: input, shape index: {}]   ;;  %s1240_s1 = inlined_call_operand.hbm [shape: bf16[2,4,128], index: 1, kind: input, shape index: {}]   ;;  %s1241_s2 = inlined_call_operand.hbm [shape: f32[1,8,128], index: 2, kind: output, shape index: {}]  }
   0x1   :  { %8 = vsyncpa [#allocation6], 0 }
   0x2   :  { %9 = vsyncpa [#allocation4], 0  ;;  %s1064_s9 = smov [#allocation2]   ;;  %s992_s13 = scalar_lea.hbm %s1239_s0, 64 }
   0x3   :  { %s15_s10 = sshll.u32 %s1064_s9, 4  ;;  %p993_p0 = scmp.ne.s32.totalorder %s1239_s0, %s992_s13  ;;  %s16_s10 = int_to_ptr.vmem [resolvable:$true] %s15_s10 }
   0x4   :  { %p996_p1 = scmp.lt.u32.totalorder %s992_s13, %s1239_s0 }
   0x6   :  { %p998_p2 = pnand %p996_p1, %p993_p0 }
   0x8   :  { %1001 = shalt.err (!%p998_p2)
}
   0x9   :  { %s1002_s18 = scalar_lea.vmem %s16_s10, 64  ;;  %p1007_p4 = scmp.lt.s32.totalorder %s16_s10, %s16_s10 }
   0xa   :  { %p1003_p3 = scmp.ne.s32.totalorder %s16_s10, %s1002_s18  ;;  %p1008_p5 = scmp.lt.s32.totalorder %s1002_s18, %s1002_s18 }
   0xc   :  { %p1009_p6 = por %p1008_p5, %p1007_p4 }
   0xe   :  { %p1010_p7 = pnand %p1009_p6, %p1003_p3 }
  0x10   :  { %1013 = shalt.err (!%p1010_p7)
}
  0x11   :  { %s1065_s19 = smov 32   ;;  %s1066_s20 = smov 2  }
  0x12   :  { %21 = dma.hbm_to_vmem [thread:$0]  %s1239_s0, 64, %s16_s10, [#allocation3], %s1065_s19, %s1065_s19, %s1066_s20  }
  0x13   :  { %s1067_s23 = smov [#allocation5]   ;;  %s1014_s27 = scalar_lea.hbm %s1240_s1, 64 }
  0x14   :  { %s27_s24 = sshll.u32 %s1067_s23, 4  ;;  %p1015_p8 = scmp.ne.s32.totalorder %s1240_s1, %s1014_s27  ;;  %s28_s24 = int_to_ptr.vmem [resolvable:$true] %s27_s24 }
  0x15   :  { %p1018_p9 = scmp.lt.u32.totalorder %s1014_s27, %s1240_s1 }
  0x17   :  { %p1020_p10 = pnand %p1018_p9, %p1015_p8 }
  0x19   :  { %1023 = shalt.err (!%p1020_p10)
}
  0x1a   :  { %s1024_s4 = scalar_lea.vmem %s28_s24, 64  ;;  %p1029_p12 = scmp.lt.s32.totalorder %s28_s24, %s28_s24 }
  0x1b   :  { %p1025_p11 = scmp.ne.s32.totalorder %s28_s24, %s1024_s4  ;;  %p1030_p13 = scmp.lt.s32.totalorder %s1024_s4, %s1024_s4 }
  0x1d   :  { %p1031_p0 = por %p1030_p13, %p1029_p12 }
  0x1f   :  { %p1032_p1 = pnand %p1031_p0, %p1025_p11 }
  0x21   :  { %1035 = shalt.err (!%p1032_p1)
}
  0x22   :  { %33 = dma.hbm_to_vmem [thread:$0]  %s1240_s1, 64, %s28_s24, [#allocation6], %s1065_s19, %s1065_s19, %s1066_s20  }
  0x23   :  { %1058 = dma.done.wait [#allocation3], 64  }
  0x24   :  { %1059 = vsyncadd [#allocation3], 4294967232 }
  0x25   :  { %1060 = dma.done.wait [#allocation6], 64  }
  0x26   :  { %1061 = vsyncadd [#allocation6], 4294967232  ;;  %v41_v0 = vld [vmem:[#allocation2] sm:$0x3]  ;;  %v424_v1 = vld [vmem:[#allocation2 + $0x2] sm:$0x3] }
  0x27   :  { %v43_v2 = vld [vmem:[#allocation5] sm:$0x3]  ;;  %v1108_v3 = vunpack.c.l.bf16 %v41_v0  ;;  %v1110_v4 = vunpack.c.l.bf16 %v424_v1  ;;  %v427_v6 = vld [vmem:[#allocation5 + $0x2] sm:$0x3]  ;;  %vm46_vm0 = vcmask 1043456   ;;  %vm125_vm9 = vcmask 1041408  }
  0x28   :  { %v1112_v5 = vunpack.c.l.bf16 %v43_v2  ;;  %v1114_v7 = vunpack.c.l.bf16 %v427_v6  ;;  %vm100_vm10 = vcmask 31744   ;;  %s1068_s6 = smov [#allocation7]  }
  0x29   :  { %v45_v8 = vmul.f32 %v1108_v3, %v1108_v3  ;;  %v429_v9 = vmul.f32 %v1110_v4, %v1110_v4  ;;  %s812_s7 = sshll.u32 %s1068_s6, 4  ;;  %s813_s7 = int_to_ptr.vmem [resolvable:$true] %s812_s7 }
  0x2a   :  { %v65_v10 = vmul.f32 %v1112_v5, %v1112_v5  ;;  %v448_v11 = vmul.f32 %v1114_v7, %v1114_v7  ;;  %s1036_s10 = scalar_lea.vmem %s813_s7, 128  ;;  %p1041_p3 = scmp.lt.s32.totalorder %s813_s7, %s813_s7 }
  0x2b   :  { %v47_v12 = vsel %vm46_vm0, %v45_v8, 0.0  ;;  %v430_v13 = vsel %vm46_vm0, %v429_v9, 0.0  ;;  %p1037_p2 = scmp.ne.s32.totalorder %s813_s7, %s1036_s10  ;;  %p1042_p4 = scmp.lt.s32.totalorder %s1036_s10, %s1036_s10 }
  0x2c   :  { %v66_v14 = vsel %vm46_vm0, %v65_v10, 0.0  ;;  %v48_v15 = vrot.slane %v47_v12, 4  ;;  %v431_v16 = vrot.slane %v430_v13, 4  ;;  %v449_v18 = vsel %vm46_vm0, %v448_v11, 0.0 }
  0x2d   :  { %v67_v17 = vrot.slane %v66_v14, 4  ;;  %v450_v19 = vrot.slane %v449_v18, 4  ;;  %p1043_p5 = por %p1042_p4, %p1041_p3 }
  0x2e   :  { %v49_v20 = vadd.f32 %v48_v15, %v47_v12  ;;  %v432_v21 = vadd.f32 %v431_v16, %v430_v13 }
  0x2f   :  { %v68_v22 = vadd.f32 %v67_v17, %v66_v14  ;;  %v451_v23 = vadd.f32 %v450_v19, %v449_v18  ;;  %p1044_p6 = pnand %p1043_p5, %p1037_p2 }
  0x30   :  { %v50_v24 = vrot.slane %v49_v20, 2  ;;  %v433_v25 = vrot.slane %v432_v21, 2 }
  0x31   :  { %v69_v26 = vrot.slane %v68_v22, 2  ;;  %v452_v27 = vrot.slane %v451_v23, 2 }
  0x32   :  { %v51_v28 = vadd.f32 %v50_v24, %v49_v20  ;;  %v434_v29 = vadd.f32 %v433_v25, %v432_v21 }
  0x33   :  { %v70_v30 = vadd.f32 %v69_v26, %v68_v22  ;;  %v453_v31 = vadd.f32 %v452_v27, %v451_v23 }
  0x34   :  { %v52_v32 = vrot.slane %v51_v28, 1  ;;  %v435_v33 = vrot.slane %v434_v29, 1 }
  0x35   :  { %v71_v34 = vrot.slane %v70_v30, 1  ;;  %v454_v35 = vrot.slane %v453_v31, 1 }
  0x36   :  { %v53_v36 = vadd.f32 %v52_v32, %v51_v28  ;;  %v436_v37 = vadd.f32 %v435_v33, %v434_v29 }
  0x37   :  { %v72_v38 = vadd.f32 %v71_v34, %v70_v30  ;;  %v455_v39 = vadd.f32 %v454_v35, %v453_v31 }
  0x38   :  { %976 = vrsqrt.f32 %v53_v36  ;;  %vm56_vm1 = vcmp.eq.f32.partialorder %v53_v36, inf  ;;  %vm58_vm2 = vcmp.eq.f32.partialorder %v53_v36, 0.0  ;;  %v59_v41 = vand.u32 2147483648, %v53_v36 }
  0x39   :  { %978 = vrsqrt.f32 %v436_v37  ;;  %vm439_vm3 = vcmp.eq.f32.partialorder %v436_v37, inf  ;;  %vm441_vm4 = vcmp.eq.f32.partialorder %v436_v37, 0.0  ;;  %v442_v44 = vand.u32 2147483648, %v436_v37 }
  0x3a   :  { %980 = vrsqrt.f32 %v72_v38  ;;  %vm75_vm5 = vcmp.eq.f32.partialorder %v72_v38, inf  ;;  %vm77_vm6 = vcmp.eq.f32.partialorder %v72_v38, 0.0  ;;  %v78_v47 = vand.u32 2147483648, %v72_v38 }
  0x3b   :  { %982 = vrsqrt.f32 %v455_v39  ;;  %vm458_vm7 = vcmp.eq.f32.partialorder %v455_v39, inf  ;;  %v461_v51 = vand.u32 2147483648, %v455_v39  ;;  %vm460_vm8 = vcmp.eq.f32.partialorder %v455_v39, 0.0 }
  0x42   :  { %v977_v40 = vpop.eup %976 }
  0x43   :  { %v979_v42 = vpop.eup %978  ;;  %v55_v43 = vmul.f32 %v977_v40, %v53_v36 }
  0x44   :  { %v981_v45 = vpop.eup %980  ;;  %v438_v46 = vmul.f32 %v979_v42, %v436_v37 }
  0x45   :  { %v983_v48 = vpop.eup %982  ;;  %v57_v49 = vsel %vm56_vm1, %v53_v36, %v55_v43  ;;  %v74_v50 = vmul.f32 %v981_v45, %v72_v38 }
  0x46   :  { %v60_v52 = vsel %vm58_vm2, %v59_v41, %v57_v49  ;;  %v440_v53 = vsel %vm439_vm3, %v436_v37, %v438_v46  ;;  %v457_v54 = vmul.f32 %v983_v48, %v455_v39 }
  0x47   :  { %v61_v55 = vadd.f32 1e-08, %v60_v52  ;;  %v443_v56 = vsel %vm441_vm4, %v442_v44, %v440_v53  ;;  %v76_v57 = vsel %vm75_vm5, %v72_v38, %v74_v50 }
  0x48   :  { %v444_v58 = vadd.f32 1e-08, %v443_v56  ;;  %v79_v59 = vsel %vm77_vm6, %v78_v47, %v76_v57  ;;  %v459_v60 = vsel %vm458_vm7, %v455_v39, %v457_v54 }
  0x49   :  { %984 = vrcp.f32 %v61_v55  ;;  %v80_v61 = vadd.f32 1e-08, %v79_v59  ;;  %v462_v62 = vsel %vm460_vm8, %v461_v51, %v459_v60 }
  0x4a   :  { %986 = vrcp.f32 %v444_v58  ;;  %v463_v63 = vadd.f32 1e-08, %v462_v62 }
  0x4b   :  { %988 = vrcp.f32 %v80_v61 }
  0x4c   :  { %990 = vrcp.f32 %v463_v63 }
  0x53   :  { %v985_v0 = vpop.eup %984 }
  0x54   :  { %v987_v1 = vpop.eup %986  ;;  %v63_v2 = vmul.f32 %v985_v0, %v1108_v3 }
  0x55   :  { %v989_v6 = vpop.eup %988  ;;  %v446_v8 = vmul.f32 %v987_v1, %v1110_v4 }
  0x56   :  { %v64_v9 = vpack.c.bf16 %v63_v2, %v63_v2  ;;  %v82_v10 = vmul.f32 %v989_v6, %v1112_v5  ;;  %v991_v11 = vpop.eup %990 }
  0x57   :  { %v447_v12 = vpack.c.bf16 %v446_v8, %v446_v8  ;;  %v465_v15 = vmul.f32 %v991_v11, %v1114_v7 }
  0x58   :  { %84 = vxpose.xlu0.c.b16.start.end [1/1] (short) %v64_v9, 128  ;;  %v83_v13 = vpack.c.bf16 %v82_v10, %v82_v10  ;;  %962 = vmatprep.subr.msk.bf16.mxu0 %vm125_vm9, %v64_v9  ;;  %v127_v14 = vsel %vm125_vm9, %v64_v9, 0 }
  0x59   :  { %467 = vxpose.xlu1.c.b16.start.end [1/1] (short) %v447_v12, 128  ;;  %891 = vmatpush3.bf16.msra.mxu0 %v127_v14  ;;  %v466_v3 = vpack.c.bf16 %v465_v15, %v465_v15  ;;  %v508_v5 = vsel %vm125_vm9, %v447_v12, 0 }
  0x5a   :  { %963 = vmatprep.subr.msk.bf16.mxu1 %vm125_vm9, %v83_v13  ;;  %964 = vmatprep.subr.msk.bf16.mxu0 %vm125_vm9, %v447_v12  ;;  %v267_v4 = vsel %vm125_vm9, %v83_v13, 0 }
  0x5b   :  { %909 = vmatpush3.bf16.msra.mxu1 %v267_v4  ;;  %v648_v16 = vsel %vm125_vm9, %v466_v3, 0 }
  0x5c   :  { %965 = vmatprep.subr.msk.bf16.mxu1 %vm125_vm9, %v466_v3 }
  0x75   :  { %226 = vxpose.xlu0.c.b16.start.end [1/1] (short) %v83_v13, 128 }
  0x76   :  { %607 = vxpose.xlu1.c.b16.start.end [1/1] (short) %v466_v3, 128 }
  0xbe   :  { %v92_v17 = vpop.trf.xlu0 }
  0xbf   :  { %892 = vmatprep.mubr.msk.bf16.mxu0 %vm100_vm10, %v92_v17  ;;  %v475_v7 = vpop.trf.xlu1 }
  0xc2   :  { %v93_v18 = vpop.trf.xlu0 }
  0xc3   :  { %893 = vmatmul.mubr.msk.bf16.vlgmr.msra.gmra.mrb[0].mxu0 %vm100_vm10, %v93_v18  ;;  %v476_v19 = vpop.trf.xlu1 }
  0xc4   :  { %927 = vmatpush3.bf16.msra.mxu0 %v508_v5 }
  0xc6   :  { %v94_v20 = vpop.trf.xlu0 }
  0xc7   :  { %896 = vmatprep.mubr.msk.bf16.mxu0 %vm100_vm10, %v94_v20  ;;  %v477_v21 = vpop.trf.xlu1 }
  0xca   :  { %v95_v22 = vpop.trf.xlu0 }
  0xcb   :  { %897 = vmatmul.mubr.msk.bf16.gmra.mrb[4].mxu0 %vm100_vm10, %v95_v22  ;;  %v478_v24 = vpop.trf.xlu1 }
  0xce   :  { %v96_v23 = vpop.trf.xlu0 }
  0xcf   :  { %900 = vmatprep.mubr.msk.bf16.mxu0 %vm100_vm10, %v96_v23  ;;  %v479_v26 = vpop.trf.xlu1 }
  0xd2   :  { %v97_v25 = vpop.trf.xlu0 }
  0xd3   :  { %901 = vmatmul.mubr.msk.bf16.gmra.mrb[8].mxu0 %vm100_vm10, %v97_v25  ;;  %v480_v29 = vpop.trf.xlu1 }
  0xd6   :  { %v98_v27 = vpop.trf.xlu0 }
  0xd7   :  { %904 = vmatprep.mubr.msk.bf16.mxu0 %vm100_vm10, %v98_v27  ;;  %v481_v31 = vpop.trf.xlu1 }
  0xda   :  { %v99_v28 = vpop.trf.xlu0 }
  0xdb   :  { %905 = vmatmul.mubr.msk.bf16.gmra.mrb[12].mxu0 %vm100_vm10, %v99_v28  ;;  %v482_v34 = vpop.trf.xlu1 }
  0xdc   :  { %928 = vmatprep.mubr.msk.bf16.mxu0 %vm100_vm10, %v475_v7 }
  0xde   :  { %v234_v30 = vpop.trf.xlu0 }
  0xdf   :  { %910 = vmatprep.mubr.msk.bf16.mxu1 %vm100_vm10, %v234_v30  ;;  %v615_v36 = vpop.trf.xlu1 }
  0xe2   :  { %v235_v32 = vpop.trf.xlu0 }
  0xe3   :  { %911 = vmatmul.mubr.msk.bf16.vlgmr.msra.gmra.mrb[0].mxu1 %vm100_vm10, %v235_v32  ;;  %929 = vmatmul.mubr.msk.bf16.vlgmr.msra.gmra.mrb[16].mxu0 %vm100_vm10, %v476_v19  ;;  %v616_v39 = vpop.trf.xlu1 }
  0xe4   :  { %945 = vmatpush3.bf16.msra.mxu1 %v648_v16  ;;  %932 = vmatprep.mubr.msk.bf16.mxu0 %vm100_vm10, %v477_v21 }
  0xe6   :  { %v236_v33 = vpop.trf.xlu0 }
  0xe7   :  { %914 = vmatprep.mubr.msk.bf16.mxu1 %vm100_vm10, %v236_v33  ;;  %v617_v41 = vpop.trf.xlu1 }
  0xea   :  { %v237_v35 = vpop.trf.xlu0 }
  0xeb   :  { %915 = vmatmul.mubr.msk.bf16.gmra.mrb[4].mxu1 %vm100_vm10, %v237_v35  ;;  %933 = vmatmul.mubr.msk.bf16.gmra.mrb[20].mxu0 %vm100_vm10, %v478_v24  ;;  %v618_v43 = vpop.trf.xlu1 }
  0xec   :  { %936 = vmatprep.mubr.msk.bf16.mxu0 %vm100_vm10, %v479_v26 }
  0xee   :  { %v238_v37 = vpop.trf.xlu0 }
  0xef   :  { %918 = vmatprep.mubr.msk.bf16.mxu1 %vm100_vm10, %v238_v37  ;;  %v619_v44 = vpop.trf.xlu1 }
  0xf2   :  { %v239_v38 = vpop.trf.xlu0 }
  0xf3   :  { %919 = vmatmul.mubr.msk.bf16.gmra.mrb[8].mxu1 %vm100_vm10, %v239_v38  ;;  %937 = vmatmul.mubr.msk.bf16.gmra.mrb[24].mxu0 %vm100_vm10, %v480_v29  ;;  %v620_v45 = vpop.trf.xlu1 }
  0xf4   :  { %940 = vmatprep.mubr.msk.bf16.mxu0 %vm100_vm10, %v481_v31 }
  0xf6   :  { %v240_v40 = vpop.trf.xlu0 }
  0xf7   :  { %922 = vmatprep.mubr.msk.bf16.mxu1 %vm100_vm10, %v240_v40  ;;  %v621_v46 = vpop.trf.xlu1 }
  0xfa   :  { %v241_v42 = vpop.trf.xlu0 }
  0xfb   :  { %923 = vmatmul.mubr.msk.bf16.gmra.mrb[12].mxu1 %vm100_vm10, %v241_v42  ;;  %941 = vmatmul.mubr.msk.bf16.gmra.mrb[28].mxu0 %vm100_vm10, %v482_v34  ;;  %v622_v47 = vpop.trf.xlu1 }
  0xfc   :  { %946 = vmatprep.mubr.msk.bf16.mxu1 %vm100_vm10, %v615_v36 }
 0x103   :  { %947 = vmatmul.mubr.msk.bf16.vlgmr.msra.gmra.mrb[16].mxu1 %vm100_vm10, %v616_v39 }
 0x104   :  { %950 = vmatprep.mubr.msk.bf16.mxu1 %vm100_vm10, %v617_v41 }
 0x10b   :  { %951 = vmatmul.mubr.msk.bf16.gmra.mrb[20].mxu1 %vm100_vm10, %v618_v43 }
 0x10c   :  { %954 = vmatprep.mubr.msk.bf16.mxu1 %vm100_vm10, %v619_v44 }
 0x113   :  { %955 = vmatmul.mubr.msk.bf16.gmra.mrb[24].mxu1 %vm100_vm10, %v620_v45 }
 0x114   :  { %958 = vmatprep.mubr.msk.bf16.mxu1 %vm100_vm10, %v621_v46 }
 0x11b   :  { %959 = vmatmul.mubr.msk.bf16.gmra.mrb[28].mxu1 %vm100_vm10, %v622_v47 }
 0x196   :  { %v894_v48 = vpop.f32.mrb[0].mxu0 }
 0x197   :  { %v163_v49 = vpop.f32.mrb[1].mxu0 }
 0x198   :  { %v895_v50 = vpop.f32.mrb[2].mxu0 }
 0x199   :  { %v166_v51 = vpop.f32.mrb[3].mxu0 }
 0x19e   :  { %v898_v52 = vpop.f32.mrb[4].mxu0 }
 0x19f   :  { %v179_v53 = vpop.f32.mrb[5].mxu0 }
 0x1a0   :  { %v899_v54 = vpop.f32.mrb[6].mxu0 }
 0x1a1   :  { %v182_v55 = vpop.f32.mrb[7].mxu0 }
 0x1a6   :  { %v902_v56 = vpop.f32.mrb[8].mxu0 }
 0x1a7   :  { %v195_v57 = vpop.f32.mrb[9].mxu0 }
 0x1a8   :  { %v903_v58 = vpop.f32.mrb[10].mxu0 }
 0x1a9   :  { %v198_v59 = vpop.f32.mrb[11].mxu0 }
 0x1ae   :  { %v906_v60 = vpop.f32.mrb[12].mxu0 }
 0x1af   :  { %v1170_v61 = vpop.f32.mrb[13].mxu0 }
 0x1b0   :  { %v1172_v62 = vpop.f32.mrb[14].mxu0 }
 0x1b1   :  { %v1174_v63 = vpop.f32.mrb[15].mxu0 }
 0x1b6   :  { %v912_v0 = vpop.f32.mrb[0].mxu1  ;;  %v1176_v1 = vpop.f32.mrb[16].mxu0 }
 0x1b7   :  { %v368_v2 = vsub.f32 %v912_v0, %v894_v48  ;;  %v303_v6 = vpop.f32.mrb[1].mxu1  ;;  %v1178_v8 = vpop.f32.mrb[17].mxu0 }
 0x1b8   :  { %v366_v9 = vsub.f32 %v303_v6, %v163_v49  ;;  %v913_v10 = vpop.f32.mrb[2].mxu1  ;;  %v1180_v11 = vpop.f32.mrb[18].mxu0 }
 0x1b9   :  { %v369_v12 = vsub.f32 %v913_v10, %v895_v50  ;;  %v306_v13 = vpop.f32.mrb[3].mxu1  ;;  %v1182_v14 = vpop.f32.mrb[19].mxu0  ;;  %v384_v5 = vmul.f32 %v368_v2, %v368_v2 }
 0x1ba   :  { %v367_v15 = vsub.f32 %v306_v13, %v166_v51  ;;  %v382_v3 = vmul.f32 %v366_v9, %v366_v9 }
 0x1bb   :  { %v385_v21 = vmul.f32 %v369_v12, %v369_v12 }
 0x1bc   :  { %v383_v4 = vmul.f32 %v367_v15, %v367_v15 }
 0x1be   :  { %v398_v16 = vadd.f32 %v383_v4, %v382_v3  ;;  %v916_v17 = vpop.f32.mrb[4].mxu1  ;;  %v1184_v7 = vpop.f32.mrb[20].mxu0 }
 0x1bf   :  { %v372_v18 = vsub.f32 %v916_v17, %v898_v52  ;;  %v319_v19 = vpop.f32.mrb[5].mxu1  ;;  %v1186_v20 = vpop.f32.mrb[21].mxu0 }
 0x1c0   :  { %v399_v22 = vadd.f32 %v398_v16, %v384_v5  ;;  %v370_v23 = vsub.f32 %v319_v19, %v179_v53  ;;  %v917_v24 = vpop.f32.mrb[6].mxu1  ;;  %v1188_v25 = vpop.f32.mrb[22].mxu0 }
 0x1c1   :  { %v373_v26 = vsub.f32 %v917_v24, %v899_v54  ;;  %v322_v27 = vpop.f32.mrb[7].mxu1  ;;  %v1190_v28 = vpop.f32.mrb[23].mxu0  ;;  %v388_v34 = vmul.f32 %v372_v18, %v372_v18 }
 0x1c2   :  { %v386_v29 = vmul.f32 %v370_v23, %v370_v23  ;;  %v400_v30 = vadd.f32 %v399_v22, %v385_v21  ;;  %v371_v31 = vsub.f32 %v322_v27, %v182_v55 }
 0x1c3   :  { %v389_v41 = vmul.f32 %v373_v26, %v373_v26 }
 0x1c4   :  { %v401_v32 = vadd.f32 %v400_v30, %v386_v29  ;;  %v387_v33 = vmul.f32 %v371_v31, %v371_v31 }
 0x1c6   :  { %v402_v35 = vadd.f32 %v401_v32, %v387_v33  ;;  %v920_v36 = vpop.f32.mrb[8].mxu1  ;;  %v1192_v37 = vpop.f32.mrb[24].mxu0 }
 0x1c7   :  { %v376_v38 = vsub.f32 %v920_v36, %v902_v56  ;;  %v335_v39 = vpop.f32.mrb[9].mxu1  ;;  %v1194_v40 = vpop.f32.mrb[25].mxu0 }
 0x1c8   :  { %v403_v42 = vadd.f32 %v402_v35, %v388_v34  ;;  %v374_v43 = vsub.f32 %v335_v39, %v195_v57  ;;  %v921_v44 = vpop.f32.mrb[10].mxu1  ;;  %v1196_v45 = vpop.f32.mrb[26].mxu0 }
 0x1c9   :  { %v377_v46 = vsub.f32 %v921_v44, %v903_v58  ;;  %v338_v47 = vpop.f32.mrb[11].mxu1  ;;  %v1198_v48 = vpop.f32.mrb[27].mxu0  ;;  %v392_v54 = vmul.f32 %v376_v38, %v376_v38 }
 0x1ca   :  { %v390_v49 = vmul.f32 %v374_v43, %v374_v43  ;;  %v404_v50 = vadd.f32 %v403_v42, %v389_v41  ;;  %v375_v51 = vsub.f32 %v338_v47, %v198_v59 }
 0x1cb   :  { %v393_v9 = vmul.f32 %v377_v46, %v377_v46 }
 0x1cc   :  { %v405_v52 = vadd.f32 %v404_v50, %v390_v49  ;;  %v391_v53 = vmul.f32 %v375_v51, %v375_v51 }
 0x1ce   :  { %v406_v55 = vadd.f32 %v405_v52, %v391_v53  ;;  %v924_v56 = vpop.f32.mrb[12].mxu1  ;;  %v1200_v0 = vpop.f32.mrb[28].mxu0 }
 0x1cf   :  { %v380_v2 = vsub.f32 %v924_v56, %v906_v60  ;;  %v351_v6 = vpop.f32.mrb[13].mxu1  ;;  %v1202_v57 = vpop.f32.mrb[29].mxu0 }
 0x1d0   :  { %v407_v10 = vadd.f32 %v406_v55, %v392_v54  ;;  %v378_v58 = vsub.f32 %v351_v6, %v1170_v61  ;;  %v925_v12 = vpop.f32.mrb[14].mxu1  ;;  %v1205_v13 = vpop.f32.mrb[30].mxu0 }
 0x1d1   :  { %v381_v59 = vsub.f32 %v925_v12, %v1172_v62  ;;  %v354_v15 = vpop.f32.mrb[15].mxu1  ;;  %v1208_v3 = vpop.f32.mrb[31].mxu0  ;;  %v396_v18 = vmul.f32 %v380_v2, %v380_v2 }
 0x1d2   :  { %v394_v4 = vmul.f32 %v378_v58, %v378_v58  ;;  %v408_v5 = vadd.f32 %v407_v10, %v393_v9  ;;  %v379_v16 = vsub.f32 %v354_v15, %v1174_v63 }
 0x1d3   :  { %v397_v23 = vmul.f32 %v381_v59, %v381_v59 }
 0x1d4   :  { %v409_v60 = vadd.f32 %v408_v5, %v394_v4  ;;  %v395_v17 = vmul.f32 %v379_v16, %v379_v16 }
 0x1d6   :  { %v410_v19 = vadd.f32 %v409_v60, %v395_v17  ;;  %v948_v21 = vpop.f32.mrb[16].mxu1 }
 0x1d7   :  { %v749_v22 = vsub.f32 %v948_v21, %v1176_v1  ;;  %v684_v61 = vpop.f32.mrb[17].mxu1 }
 0x1d8   :  { %v747_v24 = vsub.f32 %v684_v61, %v1178_v8  ;;  %v949_v26 = vpop.f32.mrb[18].mxu1  ;;  %v411_v62 = vadd.f32 %v410_v19, %v396_v18 }
 0x1d9   :  { %v750_v27 = vsub.f32 %v949_v26, %v1180_v11  ;;  %v687_v29 = vpop.f32.mrb[19].mxu1  ;;  %v765_v33 = vmul.f32 %v749_v22, %v749_v22 }
 0x1da   :  { %v748_v30 = vsub.f32 %v687_v29, %v1182_v14  ;;  %v412_v31 = vadd.f32 %v411_v62, %v397_v23  ;;  %v763_v63 = vmul.f32 %v747_v24, %v747_v24 }
 0x1db   :  { %v766_v38 = vmul.f32 %v750_v27, %v750_v27 }
 0x1dc   :  { %v764_v32 = vmul.f32 %v748_v30, %v748_v30  ;;  %413 = vadd.xlane.f32.xlu0 %v412_v31 }
 0x1de   :  { %v779_v34 = vadd.f32 %v764_v32, %v763_v63  ;;  %v952_v35 = vpop.f32.mrb[20].mxu1 }
 0x1df   :  { %v753_v1 = vsub.f32 %v952_v35, %v1184_v7  ;;  %v700_v36 = vpop.f32.mrb[21].mxu1 }
 0x1e0   :  { %v780_v39 = vadd.f32 %v779_v34, %v765_v33  ;;  %v751_v8 = vsub.f32 %v700_v36, %v1186_v20  ;;  %v953_v41 = vpop.f32.mrb[22].mxu1 }
 0x1e1   :  { %v754_v11 = vsub.f32 %v953_v41, %v1188_v25  ;;  %v703_v42 = vpop.f32.mrb[23].mxu1  ;;  %v769_v49 = vmul.f32 %v753_v1, %v753_v1 }
 0x1e2   :  { %v767_v43 = vmul.f32 %v751_v8, %v751_v8  ;;  %v781_v14 = vadd.f32 %v780_v39, %v766_v38  ;;  %v752_v44 = vsub.f32 %v703_v42, %v1190_v28 }
 0x1e3   :  { %v770_v53 = vmul.f32 %v754_v11, %v754_v11 }
 0x1e4   :  { %v782_v46 = vadd.f32 %v781_v14, %v767_v43  ;;  %v768_v47 = vmul.f32 %v752_v44, %v752_v44 }
 0x1e6   :  { %v783_v50 = vadd.f32 %v782_v46, %v768_v47  ;;  %v956_v51 = vpop.f32.mrb[24].mxu1 }
 0x1e7   :  { %v757_v7 = vsub.f32 %v956_v51, %v1192_v37  ;;  %v716_v52 = vpop.f32.mrb[25].mxu1 }
 0x1e8   :  { %v784_v54 = vadd.f32 %v783_v50, %v769_v49  ;;  %v755_v20 = vsub.f32 %v716_v52, %v1194_v40  ;;  %v957_v55 = vpop.f32.mrb[26].mxu1 }
 0x1e9   :  { %v758_v25 = vsub.f32 %v957_v55, %v1196_v45  ;;  %v719_v56 = vpop.f32.mrb[27].mxu1  ;;  %v773_v58 = vmul.f32 %v757_v7, %v757_v7 }
 0x1ea   :  { %v771_v2 = vmul.f32 %v755_v20, %v755_v20  ;;  %v785_v6 = vadd.f32 %v784_v54, %v770_v53  ;;  %v756_v28 = vsub.f32 %v719_v56, %v1198_v48 }
 0x1eb   :  { %v774_v4 = vmul.f32 %v758_v25, %v758_v25 }
 0x1ec   :  { %v786_v9 = vadd.f32 %v785_v6, %v771_v2  ;;  %v772_v10 = vmul.f32 %v756_v28, %v756_v28 }
 0x1ee   :  { %v787_v12 = vadd.f32 %v786_v9, %v772_v10  ;;  %v960_v59 = vpop.f32.mrb[28].mxu1 }
 0x1ef   :  { %v761_v37 = vsub.f32 %v960_v59, %v1200_v0  ;;  %v732_v15 = vpop.f32.mrb[29].mxu1 }
 0x1f0   :  { %v788_v5 = vadd.f32 %v787_v12, %v773_v58  ;;  %v759_v40 = vsub.f32 %v732_v15, %v1202_v57  ;;  %v961_v16 = vpop.f32.mrb[30].mxu1 }
 0x1f1   :  { %v762_v45 = vsub.f32 %v961_v16, %v1205_v13  ;;  %v735_v60 = vpop.f32.mrb[31].mxu1  ;;  %v777_v22 = vmul.f32 %v761_v37, %v761_v37 }
 0x1f2   :  { %v775_v17 = vmul.f32 %v759_v40, %v759_v40  ;;  %v789_v18 = vadd.f32 %v788_v5, %v774_v4  ;;  %v760_v48 = vsub.f32 %v735_v60, %v1208_v3 }
 0x1f3   :  { %v778_v23 = vmul.f32 %v762_v45, %v762_v45 }
 0x1f4   :  { %v790_v19 = vadd.f32 %v789_v18, %v775_v17  ;;  %v776_v21 = vmul.f32 %v760_v48, %v760_v48 }
 0x1f6   :  { %v791_v61 = vadd.f32 %v790_v19, %v776_v21 }
 0x1f8   :  { %v792_v24 = vadd.f32 %v791_v61, %v777_v22 }
 0x1fa   :  { %v793_v0 = vadd.f32 %v792_v24, %v778_v23 }
 0x1fc   :  { %794 = vadd.xlane.f32.xlu1 %v793_v0 }
 0x269   :  { %v414_v26 = vpop.xlane.xlu0 %413 }
 0x26a   :  { %v415_v62 = vrot.slane %v414_v26, 4 }
 0x26c   :  { %v416_v27 = vadd.f32 %v415_v62, %v414_v26 }
 0x26e   :  { %v417_v57 = vrot.slane %v416_v27, 2 }
 0x270   :  { %v418_v29 = vadd.f32 %v417_v57, %v416_v27 }
 0x272   :  { %v419_v30 = vrot.slane %v418_v29, 1 }
 0x274   :  { %v420_v13 = vadd.f32 %v419_v30, %v418_v29 }
 0x276   :  { %966 = vpush %v420_v13 }
 0x289   :  { %v795_v31 = vpop.xlane.xlu1 %794 }
 0x28a   :  { %v796_v63 = vrot.slane %v795_v31, 4 }
 0x28c   :  { %v797_v32 = vadd.f32 %v796_v63, %v795_v31 }
 0x28e   :  { %v798_v3 = vrot.slane %v797_v32, 2 }
 0x290   :  { %v799_v33 = vadd.f32 %v798_v3, %v797_v32 }
 0x292   :  { %v800_v34 = vrot.slane %v799_v33, 1 }
 0x294   :  { %v801_v35 = vadd.f32 %v800_v34, %v799_v33 }
 0x296   :  { %968 = vpush %v801_v35 }
 0x2a7   :  { %s967_s1 = spop %966 }
 0x2c7   :  { %s969_s8 = spop %968 }
 0x2c8   :  { %s803_s9 = sadd.f32 %s969_s8, %s967_s1 }
 0x2ca   :  { %v804_v1 = vstv %s803_s9 }
 0x2cb   :  { %805 = vst [vmem:[#allocation7] sm:$0xff] %v804_v1 }
 0x2cc   :  { %1047 = shalt.err (!%p1044_p6)
}
 0x2cd   :  { %s1048_s13 = scalar_lea.hbm %s1241_s2, 128 }
 0x2ce   :  { %p1049_p7 = scmp.ne.s32.totalorder %s1241_s2, %s1048_s13  ;;  %p1052_p8 = scmp.lt.u32.totalorder %s1048_s13, %s1241_s2 }
 0x2d0   :  { %p1054_p9 = pnand %p1052_p8, %p1049_p7 }
 0x2d2   :  { %1057 = shalt.err (!%p1054_p9)
}
 0x2d3   :  { %815 = dma.vmem_to_hbm [thread:$0]  %s813_s7, 128, %s1241_s2, [#allocation4]  }
 0x2d4   :  { %1062 = dma.done.wait [#allocation4], 128  }
 0x2d5   :  { %1063 = vsyncadd [#allocation4], 4294967168 }
 0x2d6   :  { %819 = vsyncpa [#allocation3], 1 }
 0x2d7   :  { %820 = vsyncpa [#allocation6], 1 }
 0x2d8   :  { %821 = vsyncpa [#allocation4], 1 }

</bundles_post_ra>
